<compile_context>
chip_gen: v6e
topology: v6e:2x2x1
jax: 0.10.0
libtpu: 0.0.40
codegen_flags: <defaults>
</compile_context>

<pallas_src>
import functools

import jax
import jax.numpy as jnp
from jax.experimental import pallas as pl
from jax.experimental.pallas import tpu as pltpu  # noqa: F401  (TPU backend)

HIDDEN = 128
ALIGN = 8  # f32 sublane tile height; keeps every slab segment 8-row aligned


def _round_up(n, m):
    return (n + m - 1) // m * m


def critic_kernel(x_ref, a_ref, slab_ref, out_ref, *, S, A, s_pad, a_pad):
    # Static row offsets into the packed parameter slab.
    w2h_lo = s_pad
    w2a_lo = s_pad + HIDDEN
    br = s_pad + HIDDEN + a_pad            # small-parameter block base row (8 rows)

    x = x_ref[...]                         # (B, S)  f32
    a = a_ref[...]                         # (B, A)  f32

    # One aligned (8,128) load covering every small parameter row.
    small = slab_ref[br:br + 8, :]         # (8, 128)
    b1 = small[0:1, :]                     # (1, 128)
    b2 = small[1:2, :]                     # (1, 128)
    w3_row = small[2:3, :]                 # (1, 128)  fc3 weight as a row
    b3 = small[3:4, :1]                    # (1, 1)
    gamma = small[4:5, :]                  # (1, 128)  BN weight
    beta = small[5:6, :]                   # (1, 128)  BN bias

    # ---- fc1 + ReLU (MXU, f32) ----
    w1 = slab_ref[0:S, :]                                        # (S, 128)
    h = jnp.dot(x, w1, preferred_element_type=jnp.float32) + b1
    h = jnp.maximum(h, 0.0)                                      # (B, 128)

    # ---- BatchNorm1d(128): training-mode batch mean / biased batch variance ----
    mean = jnp.mean(h, axis=0, keepdims=True)                    # (1, 128)
    d = h - mean
    var = jnp.mean(d * d, axis=0, keepdims=True)                 # biased variance
    h = d * jax.lax.rsqrt(var + 1e-5) * gamma + beta

    # ---- fc2 over concat([h, actions]) + ReLU (split matmul == concat matmul) ----
    w2h = slab_ref[w2h_lo:w2h_lo + HIDDEN, :]                    # (128, 128)
    w2a = slab_ref[w2a_lo:w2a_lo + A, :]                         # (A, 128)
    h2 = (jnp.dot(h, w2h, preferred_element_type=jnp.float32)
          + jnp.dot(a, w2a, preferred_element_type=jnp.float32)
          + b2)
    h2 = jnp.maximum(h2, 0.0)                                    # (B, 128)

    # ---- fc3 (out_features = 1): VPU multiply + lane reduction, no MXU push ----
    out = jnp.sum(h2 * w3_row, axis=-1, keepdims=True) + b3      # (B, 1)
    out_ref[...] = out.astype(out_ref.dtype)


def pack_params(params, state_size, action_size):
    """Pack all weights/biases/BN affine params into one f32 (rows, 128) slab.

    Row layout:
      [0              : s_pad)           w1   (only the first state_size rows used)
      [s_pad          : s_pad+128)       w2h
      [s_pad+128      : s_pad+128+a_pad) w2a  (only the first action_size rows used)
      small block (8 rows, aligned):
        row 0 = b1, row 1 = b2, row 2 = w3^T, row 3 = b3 (broadcast),
        row 4 = bn gamma, row 5 = bn beta, rows 6-7 unused
    """
    w1, b1, w2h, w2a, b2, w3, b3, gamma, beta = params
    s_pad = _round_up(state_size, ALIGN)
    a_pad = _round_up(action_size, ALIGN)
    rows = s_pad + HIDDEN + a_pad + 8
    slab = jnp.zeros((rows, HIDDEN), jnp.float32)
    slab = slab.at[:state_size, :].set(w1)
    slab = slab.at[s_pad:s_pad + HIDDEN, :].set(w2h)
    slab = slab.at[s_pad + HIDDEN:s_pad + HIDDEN + action_size, :].set(w2a)
    br = s_pad + HIDDEN + a_pad
    slab = slab.at[br + 0, :].set(b1.reshape(-1))
    slab = slab.at[br + 1, :].set(b2.reshape(-1))
    slab = slab.at[br + 2, :].set(w3.reshape(-1))
    slab = slab.at[br + 3, :].set(jnp.broadcast_to(b3.reshape(()), (HIDDEN,)))
    slab = slab.at[br + 4, :].set(gamma.reshape(-1))
    slab = slab.at[br + 5, :].set(beta.reshape(-1))
    return slab, s_pad, a_pad


def critic_forward(x, actions, slab, s_pad, a_pad):
    B, S = x.shape
    A = actions.shape[1]

    full = lambda shp: pl.BlockSpec(shp, lambda: tuple(0 for _ in shp))

    flops = (2 * B * (S * HIDDEN + (HIDDEN + A) * HIDDEN + HIDDEN)
             + 8 * B * HIDDEN)  # matmuls + BN/ReLU elementwise passes
    bytes_accessed = (x.size * x.dtype.itemsize
                      + actions.size * actions.dtype.itemsize
                      + slab.size * slab.dtype.itemsize
                      + B * 4)

    kernel = functools.partial(critic_kernel, S=S, A=A, s_pad=s_pad, a_pad=a_pad)
    return pl.pallas_call(
        kernel,
        out_shape=jax.ShapeDtypeStruct((B, 1), jnp.float32),
        grid=(),
        in_specs=[full(x.shape), full(actions.shape), full(slab.shape)],
        out_specs=full((B, 1)),
        cost_estimate=pl.CostEstimate(
            flops=flops, transcendentals=HIDDEN, bytes_accessed=bytes_accessed),
    )(x.astype(jnp.float32), actions.astype(jnp.float32), slab)


def init_params(key, state_size, action_size, hidden=HIDDEN):
    """Deterministic init mirroring CriticArchitecture.reset_parameters shapes/ranges."""
    ks = jax.random.split(key, 6)
    # hidden_init uses weight.size()[0] == out_features (= hidden) for fc1/fc2.
    lim1 = 1.0 / jnp.sqrt(jnp.float32(hidden))
    lim2 = 1.0 / jnp.sqrt(jnp.float32(hidden))
    # fc1: (state_size -> 128); stored transposed as (state_size, 128)
    w1 = jax.random.uniform(ks[0], (state_size, hidden), jnp.float32, -lim1, lim1)
    b1 = jax.random.uniform(ks[1], (1, hidden), jnp.float32,
                            -1.0 / jnp.sqrt(jnp.float32(state_size)),
                            1.0 / jnp.sqrt(jnp.float32(state_size)))
    # fc2: (128 + action_size -> 128); split into h-part and action-part
    w2 = jax.random.uniform(ks[2], (hidden + action_size, hidden), jnp.float32, -lim2, lim2)
    w2h, w2a = w2[:hidden], w2[hidden:]
    b2 = jax.random.uniform(ks[3], (1, hidden), jnp.float32,
                            -1.0 / jnp.sqrt(jnp.float32(hidden + action_size)),
                            1.0 / jnp.sqrt(jnp.float32(hidden + action_size)))
    # fc3: (128 -> 1), weight uniform(-0.003, 0.003), bias default Linear init
    w3 = jax.random.uniform(ks[4], (hidden, 1), jnp.float32, -0.003, 0.003)
    b3 = jax.random.uniform(ks[5], (1, 1), jnp.float32,
                            -1.0 / jnp.sqrt(jnp.float32(hidden)),
                            1.0 / jnp.sqrt(jnp.float32(hidden)))
    # BatchNorm1d default affine params (fresh module): gamma=1, beta=0
    gamma = jnp.ones((1, hidden), jnp.float32)
    beta = jnp.zeros((1, hidden), jnp.float32)
    return (w1, b1, w2h, w2a, b2, w3, b3, gamma, beta)


if __name__ == "__main__":
    B, STATE, ACTION = 8, 16, 4
    key = jax.random.PRNGKey(0)
    kx, ka, kp = jax.random.split(key, 3)
    x = jax.random.normal(kx, (B, STATE), jnp.float32)
    actions = jax.random.normal(ka, (B, ACTION), jnp.float32)
    params = init_params(kp, STATE, ACTION)

    # Plain-JAX reference (same math, f32)
    w1, b1, w2h, w2a, b2, w3, b3, gamma, beta = params
    h = jnp.maximum(x @ w1 + b1, 0.0)
    m = h.mean(0, keepdims=True)
    v = ((h - m) ** 2).mean(0, keepdims=True)
    h = (h - m) / jnp.sqrt(v + 1e-5) * gamma + beta
    h2 = jnp.maximum(h @ w2h + actions @ w2a + b2, 0.0)
    ref = h2 @ w3 + b3

    slab, s_pad, a_pad = pack_params(params, STATE, ACTION)
    out = critic_forward(x, actions, slab, s_pad, a_pad)
    jax.block_until_ready(out)
    assert out.shape == (B, 1)
    assert bool(jnp.all(jnp.isfinite(out)))
    assert jnp.allclose(out, ref, atol=1e-4), (out, ref)

    print("KERNEL_OK")
</pallas_src>

<mosaic_0001>
module attributes {stable_mosaic.version = 11 : i64} {
  func.func @critic_kernel(%arg0: memref<8x16xf32, #tpu.memory_space<vmem>>, %arg1: memref<8x4xf32, #tpu.memory_space<vmem>>, %arg2: memref<160x128xf32, #tpu.memory_space<vmem>>, %arg3: memref<8x1xf32, #tpu.memory_space<vmem>>) attributes {dimension_semantics = [], scalar_prefetch = 0 : i64, scratch_operands = 0 : i64, tpu.core_type = #tpu.core_type<tc>} {
    %c0 = arith.constant 0 : index
    %c0_0 = arith.constant 0 : index
    %0 = vector.load %arg0[%c0, %c0_0] : memref<8x16xf32, #tpu.memory_space<vmem>>, vector<8x16xf32>
    %c0_1 = arith.constant 0 : index
    %c0_2 = arith.constant 0 : index
    %1 = vector.load %arg1[%c0_1, %c0_2] : memref<8x4xf32, #tpu.memory_space<vmem>>, vector<8x4xf32>
    %c152 = arith.constant 152 : index
    %c0_3 = arith.constant 0 : index
    %2 = vector.load %arg2[%c152, %c0_3] : memref<160x128xf32, #tpu.memory_space<vmem>>, vector<8x128xf32>
    %3 = vector.extract_strided_slice %2 {offsets = [0, 0], sizes = [1, 128], strides = [1, 1]} : vector<8x128xf32> to vector<1x128xf32>
    %4 = vector.extract_strided_slice %2 {offsets = [1, 0], sizes = [1, 128], strides = [1, 1]} : vector<8x128xf32> to vector<1x128xf32>
    %5 = vector.extract_strided_slice %2 {offsets = [2, 0], sizes = [1, 128], strides = [1, 1]} : vector<8x128xf32> to vector<1x128xf32>
    %6 = vector.extract_strided_slice %2 {offsets = [3, 0], sizes = [1, 1], strides = [1, 1]} : vector<8x128xf32> to vector<1x1xf32>
    %7 = vector.extract_strided_slice %2 {offsets = [4, 0], sizes = [1, 128], strides = [1, 1]} : vector<8x128xf32> to vector<1x128xf32>
    %8 = vector.extract_strided_slice %2 {offsets = [5, 0], sizes = [1, 128], strides = [1, 1]} : vector<8x128xf32> to vector<1x128xf32>
    %c0_4 = arith.constant 0 : index
    %c0_5 = arith.constant 0 : index
    %9 = vector.load %arg2[%c0_4, %c0_5] : memref<160x128xf32, #tpu.memory_space<vmem>>, vector<16x128xf32>
    %cst = arith.constant dense<0.000000e+00> : vector<8x128xf32>
    %10 = tpu.matmul %0, %9, %cst {dimension_numbers = #tpu.dot_dimension_numbers<[1], [0], [0], [1], [0, 0, 1, 1], [], []>} : vector<8x16xf32>, vector<16x128xf32>, vector<8x128xf32> -> vector<8x128xf32>
    %11 = vector.broadcast %3 : vector<1x128xf32> to vector<8x128xf32>
    %12 = arith.addf %10, %11 : vector<8x128xf32>
    %cst_6 = arith.constant 0.000000e+00 : f32
    %13 = vector.broadcast %cst_6 : f32 to vector<8x128xf32>
    %14 = arith.maximumf %12, %13 : vector<8x128xf32>
    %cst_7 = arith.constant dense<0.000000e+00> : vector<128xf32>
    %15 = vector.multi_reduction <add>, %14, %cst_7 [0] : vector<8x128xf32> to vector<128xf32>
    %16 = vector.shape_cast %15 : vector<128xf32> to vector<1x128xf32>
    %cst_8 = arith.constant 8.000000e+00 : f32
    %17 = vector.broadcast %cst_8 : f32 to vector<1x128xf32>
    %18 = arith.divf %16, %17 : vector<1x128xf32>
    %19 = vector.broadcast %18 : vector<1x128xf32> to vector<8x128xf32>
    %20 = arith.subf %14, %19 : vector<8x128xf32>
    %21 = arith.mulf %20, %20 : vector<8x128xf32>
    %cst_9 = arith.constant dense<0.000000e+00> : vector<128xf32>
    %22 = vector.multi_reduction <add>, %21, %cst_9 [0] : vector<8x128xf32> to vector<128xf32>
    %23 = vector.shape_cast %22 : vector<128xf32> to vector<1x128xf32>
    %cst_10 = arith.constant 8.000000e+00 : f32
    %24 = vector.broadcast %cst_10 : f32 to vector<1x128xf32>
    %25 = arith.divf %23, %24 : vector<1x128xf32>
    %cst_11 = arith.constant 9.99999974E-6 : f32
    %26 = vector.broadcast %cst_11 : f32 to vector<1x128xf32>
    %27 = arith.addf %25, %26 : vector<1x128xf32>
    %28 = math.rsqrt %27 : vector<1x128xf32>
    %29 = vector.broadcast %28 : vector<1x128xf32> to vector<8x128xf32>
    %30 = arith.mulf %20, %29 : vector<8x128xf32>
    %31 = vector.broadcast %7 : vector<1x128xf32> to vector<8x128xf32>
    %32 = arith.mulf %30, %31 : vector<8x128xf32>
    %33 = vector.broadcast %8 : vector<1x128xf32> to vector<8x128xf32>
    %34 = arith.addf %32, %33 : vector<8x128xf32>
    %c16 = arith.constant 16 : index
    %c0_12 = arith.constant 0 : index
    %35 = vector.load %arg2[%c16, %c0_12] : memref<160x128xf32, #tpu.memory_space<vmem>>, vector<128x128xf32>
    %c144 = arith.constant 144 : index
    %c0_13 = arith.constant 0 : index
    %36 = vector.load %arg2[%c144, %c0_13] : memref<160x128xf32, #tpu.memory_space<vmem>>, vector<4x128xf32>
    %cst_14 = arith.constant dense<0.000000e+00> : vector<8x128xf32>
    %37 = tpu.matmul %34, %35, %cst_14 {dimension_numbers = #tpu.dot_dimension_numbers<[1], [0], [0], [1], [0, 0, 1, 1], [], []>} : vector<8x128xf32>, vector<128x128xf32>, vector<8x128xf32> -> vector<8x128xf32>
    %cst_15 = arith.constant dense<0.000000e+00> : vector<8x128xf32>
    %38 = tpu.matmul %1, %36, %cst_15 {dimension_numbers = #tpu.dot_dimension_numbers<[1], [0], [0], [1], [0, 0, 1, 1], [], []>} : vector<8x4xf32>, vector<4x128xf32>, vector<8x128xf32> -> vector<8x128xf32>
    %39 = arith.addf %37, %38 : vector<8x128xf32>
    %40 = vector.broadcast %4 : vector<1x128xf32> to vector<8x128xf32>
    %41 = arith.addf %39, %40 : vector<8x128xf32>
    %cst_16 = arith.constant 0.000000e+00 : f32
    %42 = vector.broadcast %cst_16 : f32 to vector<8x128xf32>
    %43 = arith.maximumf %41, %42 : vector<8x128xf32>
    %44 = vector.broadcast %5 : vector<1x128xf32> to vector<8x128xf32>
    %45 = arith.mulf %43, %44 : vector<8x128xf32>
    %cst_17 = arith.constant dense<0.000000e+00> : vector<8xf32>
    %46 = vector.multi_reduction <add>, %45, %cst_17 [1] : vector<8x128xf32> to vector<8xf32>
    %47 = vector.shape_cast %46 : vector<8xf32> to vector<8x1xf32>
    %48 = vector.broadcast %6 : vector<1x1xf32> to vector<8x1xf32>
    %49 = arith.addf %47, %48 : vector<8x1xf32>
    %c0_18 = arith.constant 0 : index
    %c0_19 = arith.constant 0 : index
    %50 = vector.load %arg3[%c0_18, %c0_19] : memref<8x1xf32, #tpu.memory_space<vmem>>, vector<8x1xf32>
    tpu.vector_store %arg3[%c0_18, %c0_19], %49 {strides = array<i32>} : memref<8x1xf32, #tpu.memory_space<vmem>>, vector<8x1xf32>,
    return
  }
}

</mosaic_0001>

<bundles_post_ra>
// kernel: tpu_custom_call.1
= control target key start
LH: loop header
LB: loop body
LE: loop exit
PB: predicated region body
PF: predicated region fallthrough
CT: control target
= control target key end

     0   :  { %8 = vsyncpa [#allocation3], 0  ;;  %s433_s12 = smov [#allocation2]   ;;  %s492_s0 = inlined_call_operand.vmem [shape: f32[8,16], index: 0, kind: input, shape index: {}]   ;;  %s493_s1 = inlined_call_operand.vmem [shape: f32[8,4], index: 1, kind: input, shape index: {}]   ;;  %s494_s2 = inlined_call_operand.hbm [shape: f32[160,128], index: 2, kind: input, shape index: {}]   ;;  %s495_s3 = inlined_call_operand.vmem [shape: f32[8,1], index: 3, kind: output, shape index: {}]  }
   0x1   :  { %s18_s13 = sshll.u32 %s433_s12, 4  ;;  %s19_s13 = int_to_ptr.vmem [resolvable:$true] %s18_s13 }
   0x2   :  { %s419_s14 = scalar_lea.vmem %s19_s13, 2560  ;;  %p424_p1 = scmp.lt.s32.totalorder %s19_s13, %s19_s13 }
   0x3   :  { %p420_p0 = scmp.ne.s32.totalorder %s19_s13, %s419_s14  ;;  %p425_p2 = scmp.lt.s32.totalorder %s419_s14, %s419_s14 }
   0x5   :  { %p426_p3 = por %p425_p2, %p424_p1 }
   0x7   :  { %p427_p4 = pnand %p426_p3, %p420_p0 }
   0x9   :  { %430 = shalt.err (!%p427_p4)
}
   0xa   :  { %s434_s15 = smov 128   ;;  %s435_s16 = smov 8  }
   0xb   :  { %24 = dma.hbm_to_vmem [thread:$0]  %s494_s2, 2560, %s19_s13, [#allocation3], %s434_s15, %s434_s15, %s435_s16  }
   0xc   :  { %431 = dma.done.wait [#allocation3], 2560  }
   0xd   :  { %432 = vsyncadd [#allocation3], 4294964736  ;;  %v436_v0 = vmov 0.0   ;;  %vm437_vm0 = vmmov 0   ;;  %v32_v1 = vld [vmem:[#allocation2 + $0x8] sm:$0xff]  ;;  %v31_v2 = vld [vmem:[#allocation2] sm:$0xff]  ;;  %v33_v22 = vlaneseq }
   0xe   :  { %357 = vmatprep.subr.mxu0 %v436_v0  ;;  %361 = vmatprep.mubr.msk.f32.mxu0 %vm437_vm0, %v436_v0  ;;  %v28_v3 = vld [vmem:[%s492_s0] sm:$0xff]  ;;  %vm37_vm1 = vcmask 130048   ;;  %v157_v4 = vld [vmem:[#allocation2 + $0x88] sm:$0xff]  ;;  %v155_v6 = vld [vmem:[#allocation2 + $0x78] sm:$0xff]  ;;  %vm163_vm2 = vcmask 1043456   ;;  %vm159_vm3 = vcmask 31744  }
   0xf   :  { %369 = vmatprep.subr.mxu1 %v436_v0  ;;  %401 = vmatprep.mubr.msk.f32.mxu1 %vm437_vm0, %v436_v0  ;;  %v156_v5 = vld [vmem:[#allocation2 + $0x80] sm:$0xff]  ;;  %v154_v7 = vld [vmem:[#allocation2 + $0x70] sm:$0xff]  ;;  %v153_v8 = vld [vmem:[#allocation2 + $0x68] sm:$0xff]  ;;  %v34_v23 = vshrl.u32 %v33_v22, 7  ;;  %vm325_vm4 = vcmask 7168  }
  0x10   :  { %358 = vmatpush3.msra.mxu0 %v32_v1  ;;  %370 = vmatpush3.msra.mxu1 %v157_v4  ;;  %v152_v9 = vld [vmem:[#allocation2 + $0x60] sm:$0xff]  ;;  %v151_v10 = vld [vmem:[#allocation2 + $0x58] sm:$0xff]  ;;  %v150_v11 = vld [vmem:[#allocation2 + $0x50] sm:$0xff] }
  0x11   :  { %359 = vmatprep.subr.mxu0 %v436_v0  ;;  %371 = vmatprep.subr.mxu1 %v436_v0  ;;  %v149_v12 = vld [vmem:[#allocation2 + $0x48] sm:$0xff]  ;;  %v148_v13 = vld [vmem:[#allocation2 + $0x40] sm:$0xff]  ;;  %v147_v14 = vld [vmem:[#allocation2 + $0x38] sm:$0xff]  ;;  %v35_v24 = vsub.s32 0, %v34_v23  ;;  %v134_v48 = vsub.s32 4, %v34_v23  ;;  %v139_v49 = vsub.s32 5, %v34_v23 }
  0x12   :  { %360 = vmatpush3.msra.mxu0 %v31_v2  ;;  %372 = vmatpush3.msra.mxu1 %v156_v5  ;;  %v146_v15 = vld [vmem:[#allocation2 + $0x30] sm:$0xff]  ;;  %v145_v16 = vld [vmem:[#allocation2 + $0x28] sm:$0xff]  ;;  %v144_v17 = vld [vmem:[#allocation2 + $0x20] sm:$0xff]  ;;  %v309_v58 = vsub.s32 1, %v34_v23  ;;  %v315_v60 = vsub.s32 2, %v34_v23  ;;  %v322_v4 = vsub.s32 3, %v34_v23 }
  0x13   :  { %362 = vmatmul.mubr.msk.f32.vlgmr.msra.gmra.mxu0 %vm37_vm1, %v28_v3  ;;  %364 = vmatprep.subr.mxu0 %v436_v0  ;;  %v158_v18 = vld [vmem:[#allocation2 + $0x90] sm:$0xf]  ;;  %v143_v19 = vld [vmem:[#allocation2 + $0x18] sm:$0xff]  ;;  %v29_v20 = vld [vmem:[%s493_s1] sm:$0xff] }
  0x14   :  { %366 = vmatprep.mubr.msk.f32.mxu0 %vm437_vm0, %v436_v0  ;;  %373 = vmatprep.subr.mxu1 %v436_v0  ;;  %v142_v21 = vld [vmem:[#allocation2 + $0x10] sm:$0xff]  ;;  %v30_v25 = vld [vmem:[#allocation2 + $0x98] sm:$0xff] }
  0x15   :  { %374 = vmatpush3.msra.mxu1 %v155_v6  ;;  %365 = vmatpush3.msk.msra.mxu0 %vm163_vm2, %v158_v18  ;;  %v36_v26 = vrot.slane %v30_v25, %v35_v24  ;;  %v135_v50 = vrot.slane %v30_v25, %v134_v48  ;;  %v140_v53 = vrot.slane %v30_v25, %v139_v49 }
  0x16   :  { %375 = vmatprep.subr.mxu1 %v436_v0  ;;  %v310_v59 = vrot.slane %v30_v25, %v309_v58  ;;  %v316_v1 = vrot.slane %v30_v25, %v315_v60  ;;  %v323_v5 = vrot.slane %v30_v25, %v322_v4 }
  0x17   :  { %376 = vmatpush3.msra.mxu1 %v154_v7  ;;  %367 = vmatmul.mubr.msk.f32.vlgmr.msra.gmra.mxu0 %vm159_vm3, %v29_v20 }
  0x18   :  { %377 = vmatprep.subr.mxu1 %v436_v0 }
  0x19   :  { %378 = vmatpush3.msra.mxu1 %v153_v8 }
  0x1a   :  { %379 = vmatprep.subr.mxu1 %v436_v0 }
  0x1b   :  { %380 = vmatpush3.msra.mxu1 %v152_v9 }
  0x1c   :  { %381 = vmatprep.subr.mxu1 %v436_v0 }
  0x1d   :  { %382 = vmatpush3.msra.mxu1 %v151_v10 }
  0x1e   :  { %383 = vmatprep.subr.mxu1 %v436_v0 }
  0x1f   :  { %384 = vmatpush3.msra.mxu1 %v150_v11 }
  0x20   :  { %385 = vmatprep.subr.mxu1 %v436_v0 }
  0x21   :  { %386 = vmatpush3.msra.mxu1 %v149_v12 }
  0x22   :  { %387 = vmatprep.subr.mxu1 %v436_v0 }
  0x23   :  { %388 = vmatpush3.msra.mxu1 %v148_v13 }
  0x24   :  { %389 = vmatprep.subr.mxu1 %v436_v0 }
  0x25   :  { %390 = vmatpush3.msra.mxu1 %v147_v14 }
  0x26   :  { %391 = vmatprep.subr.mxu1 %v436_v0 }
  0x27   :  { %392 = vmatpush3.msra.mxu1 %v146_v15 }
  0x28   :  { %393 = vmatprep.subr.mxu1 %v436_v0 }
  0x29   :  { %394 = vmatpush3.msra.mxu1 %v145_v16 }
  0x2a   :  { %395 = vmatprep.subr.mxu1 %v436_v0 }
  0x2b   :  { %396 = vmatpush3.msra.mxu1 %v144_v17 }
  0x2c   :  { %397 = vmatprep.subr.mxu1 %v436_v0 }
  0x2d   :  { %398 = vmatpush3.msra.mxu1 %v143_v19 }
  0x2e   :  { %399 = vmatprep.subr.mxu1 %v436_v0 }
  0x2f   :  { %400 = vmatpush3.msra.mxu1 %v142_v21 }
  0xd3   :  { %v107_v27 = vpop.f32.mrf.mxu0 }
  0xd4   :  { %v108_v28 = vadd.f32 %v107_v27, %v36_v26 }
  0xd5   :  { %v363_v29 = vpop.f32.mrf.mxu0 }
  0xd6   :  { %v111_v30 = vmax.f32 %v108_v28, 0.0 }
  0xd7   :  { %v233_v56 = vpop.f32.mrf.mxu0 }
  0xd8   :  { %v112_v31 = vrot.slane %v111_v30, 4 }
  0xd9   :  { %v368_v57 = vpop.f32.mrf.mxu0 }
  0xda   :  { %v113_v32 = vadd.f32 %v112_v31, %v111_v30 }
  0xdc   :  { %v114_v33 = vrot.slane %v113_v32, 2 }
  0xde   :  { %v115_v34 = vadd.f32 %v114_v33, %v113_v32 }
  0xe0   :  { %v116_v35 = vrot.slane %v115_v34, 1 }
  0xe2   :  { %v117_v36 = vadd.f32 %v116_v35, %v115_v34 }
  0xe4   :  { %v119_v37 = vmul.f32 0.125, %v117_v36 }
  0xe6   :  { %v120_v38 = vsub.f32 %v111_v30, %v119_v37 }
  0xe8   :  { %v121_v39 = vmul.f32 %v120_v38, %v120_v38 }
  0xea   :  { %v122_v40 = vrot.slane %v121_v39, 4 }
  0xec   :  { %v123_v41 = vadd.f32 %v122_v40, %v121_v39 }
  0xee   :  { %v124_v42 = vrot.slane %v123_v41, 2 }
  0xf0   :  { %v125_v43 = vadd.f32 %v124_v42, %v123_v41 }
  0xf2   :  { %v126_v44 = vrot.slane %v125_v43, 1 }
  0xf4   :  { %v127_v45 = vadd.f32 %v126_v44, %v125_v43 }
  0xf6   :  { %v128_v46 = vmul.f32 0.125, %v127_v45 }
  0xf8   :  { %v129_v47 = vadd.f32 1e-05, %v128_v46 }
  0xfa   :  { %409 = vrsqrt.f32 %v129_v47 }
 0x107   :  { %v410_v51 = vpop.eup %409 }
 0x108   :  { %v131_v52 = vmul.f32 %v410_v51, %v120_v38 }
 0x10a   :  { %v136_v54 = vmul.f32 %v135_v50, %v131_v52 }
 0x10c   :  { %v141_v55 = vadd.f32 %v140_v53, %v136_v54 }
 0x10e   :  { %402 = vmatmul.mubr.f32.vlgmr.msra.gmra.mxu1 %v141_v55 }
 0x1ce   :  { %v303_v61 = vpop.f32.mrf.mxu1 }
 0x1cf   :  { %v304_v62 = vadd.f32 %v303_v61, %v233_v56 }
 0x1d0   :  { %v403_v63 = vpop.f32.mrf.mxu1 }
 0x1d1   :  { %v311_v0 = vadd.f32 %v310_v59, %v304_v62 }
 0x1d3   :  { %v312_v2 = vmax.f32 %v311_v0, 0.0 }
 0x1d5   :  { %v317_v3 = vmul.f32 %v316_v1, %v312_v2 }
 0x1d7   :  { %318 = vadd.xlane.f32.xlu0 %v317_v3 }
 0x260   :  { %v319_v6 = vpop.xlane.xlu0 %318 }
 0x261   :  { %v324_v7 = vadd.f32 %v323_v5, %v319_v6 }
 0x263   :  { %326 = vst.msk [vmem:[%s495_s3] sm:$0xff] %vm325_vm4, %v324_v7 }
 0x264   :  { %331 = vsyncpa [#allocation3], 1 }

</bundles_post_ra>
